<compile_context>
chip_gen: v5e
topology: v5e:2x2
jax: 0.10.0
libtpu: 0.0.40
codegen_flags: <defaults>
</compile_context>

<pallas_src>
import jax
import jax.numpy as jnp
from jax.experimental import pallas as pl
from jax.experimental.pallas import tpu as pltpu


def mlp_t_kernel(x_ref, w1_ref, b1_ref, w2_ref, b2_ref, o_ref):
    """Transposed MLP tile: every operand/result is lane-dense in batch.

    x_ref : (n_obs, TB)   w1_ref: (H, n_obs)   b1_ref: (H, 1)
    w2_ref: (A, H)        b2_ref: (A, 1)       o_ref : (A, TB)
    """
    # hidden: (H, n_obs) @ (n_obs, TB) -> (H, TB), f32 MXU accumulation
    h = jnp.dot(w1_ref[...], x_ref[...], preferred_element_type=jnp.float32)
    h = jnp.maximum(h + b1_ref[...], 0.0)          # bias + ReLU on the VPU
    # output: (A, H) @ (H, TB) -> (A, TB); full-lane (unmasked) stores
    out = jnp.dot(w2_ref[...], h, preferred_element_type=jnp.float32)
    o_ref[...] = (out + b2_ref[...]).astype(o_ref.dtype)


def net_forward(x, w1, b1, w2, b2, *, max_resident_batch=8192, block_b=2048):
    """Forward pass of Net: relu(x @ w1.T + b1) @ w2.T + b2.

    Weights are in PyTorch nn.Linear layout: w1 (H, n_obs), b1 (H,),
    w2 (A, H), b2 (A,).  x is (B, n_obs); returns (B, A).
    """
    B, n_obs = x.shape
    H = w1.shape[0]
    A = w2.shape[0]

    # Lane-dense layout: batch on the lane (last) axis everywhere.
    x_t = x.T                       # (n_obs, B) — layout plumbing only
    b1c = b1.reshape(H, 1)
    b2c = b2.reshape(A, 1)

    if B <= max_resident_batch:
        # Common CEM path: one grid step, whole batch resident.  Block equals
        # the full array dims -> no (8,128) divisibility requirement, no pad.
        tb, b_pad = B, B
    else:
        # Huge batches: tile the batch (lane) axis.  256-aligned tile matches
        # the v6e/v7x MXU and is a multiple of 128 (lane) for all chips.
        tb = max(256, (block_b // 256) * 256)
        b_pad = pl.cdiv(B, tb) * tb
        if b_pad != B:
            x_t = jnp.pad(x_t, ((0, 0), (0, b_pad - B)))
    grid = (b_pad // tb,)

    itemsize = jnp.dtype(x.dtype).itemsize
    cost = pl.CostEstimate(
        flops=2 * b_pad * (n_obs * H + H * A),
        transcendentals=0,
        bytes_accessed=(b_pad * (n_obs + A) + H * (n_obs + 1) + A * (H + 1))
        * itemsize,
    )

    out_t = pl.pallas_call(
        mlp_t_kernel,
        out_shape=jax.ShapeDtypeStruct((A, b_pad), x.dtype),
        grid_spec=pltpu.PrefetchScalarGridSpec(
            num_scalar_prefetch=0,
            grid=grid,
            in_specs=[
                pl.BlockSpec((n_obs, tb), lambda i: (0, i)),  # x_t: streamed
                pl.BlockSpec((H, n_obs), lambda i: (0, 0)),   # w1: VMEM-resident
                pl.BlockSpec((H, 1), lambda i: (0, 0)),       # b1: VMEM-resident
                pl.BlockSpec((A, H), lambda i: (0, 0)),       # w2: VMEM-resident
                pl.BlockSpec((A, 1), lambda i: (0, 0)),       # b2: VMEM-resident
            ],
            out_specs=pl.BlockSpec((A, tb), lambda i: (0, i)),
        ),
        compiler_params=pltpu.CompilerParams(
            dimension_semantics=("parallel",),  # shard batch grid over TCs (v7x)
        ),
        cost_estimate=cost,
    )(x_t, w1, b1c, w2, b2c)

    if b_pad != B:
        out_t = out_t[:, :B]
    return out_t.T  # back to PyTorch convention (B, A); tiny (A,B) transpose


def init_params(key, n_obs, hidden_size, n_actions, dtype=jnp.float32):
    """PyTorch-layout params matching nn.Linear default U(-1/sqrt(fan_in), .)."""
    k1, k2, k3, k4 = jax.random.split(key, 4)
    bound1 = 1.0 / (n_obs ** 0.5)
    bound2 = 1.0 / (hidden_size ** 0.5)
    w1 = jax.random.uniform(k1, (hidden_size, n_obs), dtype, -bound1, bound1)
    b1 = jax.random.uniform(k2, (hidden_size,), dtype, -bound1, bound1)
    w2 = jax.random.uniform(k3, (n_actions, hidden_size), dtype, -bound2, bound2)
    b2 = jax.random.uniform(k4, (n_actions,), dtype, -bound2, bound2)
    return w1, b1, w2, b2


def _ref(x, w1, b1, w2, b2):
    return jnp.maximum(x @ w1.T + b1, 0.0) @ w2.T + b2


if __name__ == "__main__":
    # FrozenLake-4x4 sizes: 16 one-hot observations, 4 actions, hidden=128.
    n_obs, hidden_size, n_actions = 16, 128, 4
    key = jax.random.PRNGKey(0)
    kx, kx2, kp = jax.random.split(key, 3)
    w1, b1, w2, b2 = init_params(kp, n_obs, hidden_size, n_actions)

    # Common path: whole batch in a single grid step, no padding.
    x = jax.random.normal(kx, (200, n_obs), jnp.float32)
    out = jax.block_until_ready(net_forward(x, w1, b1, w2, b2))
    assert out.shape == (200, n_actions)
    assert jnp.allclose(out, _ref(x, w1, b1, w2, b2), atol=1e-5, rtol=1e-5)

    # Tiled path: force the multi-step batch grid + lane padding (600 -> 3x256).
    x2 = jax.random.normal(kx2, (600, n_obs), jnp.float32)
    out2 = jax.block_until_ready(
        net_forward(x2, w1, b1, w2, b2, max_resident_batch=256, block_b=256)
    )
    assert out2.shape == (600, n_actions)
    assert jnp.allclose(out2, _ref(x2, w1, b1, w2, b2), atol=1e-5, rtol=1e-5)

    print("KERNEL_OK")
</pallas_src>

<mosaic_0001>
module attributes {stable_mosaic.version = 11 : i64} {
  func.func @mlp_t_kernel(%arg0: i32, %arg1: memref<16x200xf32, #tpu.memory_space<vmem>>, %arg2: memref<128x16xf32, #tpu.memory_space<vmem>>, %arg3: memref<128x1xf32, #tpu.memory_space<vmem>>, %arg4: memref<4x128xf32, #tpu.memory_space<vmem>>, %arg5: memref<4x1xf32, #tpu.memory_space<vmem>>, %arg6: memref<4x200xf32, #tpu.memory_space<vmem>>) attributes {dimension_semantics = [#tpu.dimension_semantics<parallel>], iteration_bounds = array<i64: 1>, scalar_prefetch = 0 : i64, scratch_operands = 0 : i64, tpu.core_type = #tpu.core_type<tc>, window_params = [{transform_indices = @transform_0, window_bounds = array<i64: 16, 200>}, {pipeline_mode = #tpu.pipeline_mode<synchronous>, transform_indices = @transform_1, window_bounds = array<i64: 128, 16>}, {pipeline_mode = #tpu.pipeline_mode<synchronous>, transform_indices = @transform_2, window_bounds = array<i64: 128, 1>}, {pipeline_mode = #tpu.pipeline_mode<synchronous>, transform_indices = @transform_3, window_bounds = array<i64: 4, 128>}, {pipeline_mode = #tpu.pipeline_mode<synchronous>, transform_indices = @transform_4, window_bounds = array<i64: 4, 1>}, {transform_indices = @transform_5, window_bounds = array<i64: 4, 200>}]} {
    %c0 = arith.constant 0 : index
    %c0_0 = arith.constant 0 : index
    %0 = vector.load %arg2[%c0, %c0_0] : memref<128x16xf32, #tpu.memory_space<vmem>>, vector<128x16xf32>
    %c0_1 = arith.constant 0 : index
    %c0_2 = arith.constant 0 : index
    %1 = vector.load %arg1[%c0_1, %c0_2] : memref<16x200xf32, #tpu.memory_space<vmem>>, vector<16x200xf32>
    %cst = arith.constant dense<0.000000e+00> : vector<128x200xf32>
    %2 = tpu.matmul %0, %1, %cst {dimension_numbers = #tpu.dot_dimension_numbers<[1], [0], [0], [1], [0, 0, 1, 1], [], []>} : vector<128x16xf32>, vector<16x200xf32>, vector<128x200xf32> -> vector<128x200xf32>
    %c0_3 = arith.constant 0 : index
    %c0_4 = arith.constant 0 : index
    %3 = vector.load %arg3[%c0_3, %c0_4] : memref<128x1xf32, #tpu.memory_space<vmem>>, vector<128x1xf32>
    %4 = vector.broadcast %3 : vector<128x1xf32> to vector<128x200xf32>
    %5 = arith.addf %2, %4 : vector<128x200xf32>
    %cst_5 = arith.constant 0.000000e+00 : f32
    %6 = vector.broadcast %cst_5 : f32 to vector<128x200xf32>
    %7 = arith.maximumf %5, %6 : vector<128x200xf32>
    %c0_6 = arith.constant 0 : index
    %c0_7 = arith.constant 0 : index
    %8 = vector.load %arg4[%c0_6, %c0_7] : memref<4x128xf32, #tpu.memory_space<vmem>>, vector<4x128xf32>
    %cst_8 = arith.constant dense<0.000000e+00> : vector<4x200xf32>
    %9 = tpu.matmul %8, %7, %cst_8 {dimension_numbers = #tpu.dot_dimension_numbers<[1], [0], [0], [1], [0, 0, 1, 1], [], []>} : vector<4x128xf32>, vector<128x200xf32>, vector<4x200xf32> -> vector<4x200xf32>
    %c0_9 = arith.constant 0 : index
    %c0_10 = arith.constant 0 : index
    %10 = vector.load %arg5[%c0_9, %c0_10] : memref<4x1xf32, #tpu.memory_space<vmem>>, vector<4x1xf32>
    %11 = vector.broadcast %10 : vector<4x1xf32> to vector<4x200xf32>
    %12 = arith.addf %9, %11 : vector<4x200xf32>
    %c0_11 = arith.constant 0 : index
    %c0_12 = arith.constant 0 : index
    %13 = vector.load %arg6[%c0_11, %c0_12] : memref<4x200xf32, #tpu.memory_space<vmem>>, vector<4x200xf32>
    tpu.vector_store %arg6[%c0_11, %c0_12], %12 {strides = array<i32>} : memref<4x200xf32, #tpu.memory_space<vmem>>, vector<4x200xf32>,
    return
  }
  func.func @transform_0(%arg0: i32) -> (i32, i32) {
    %c0_i32 = arith.constant 0 : i32
    %c0_i32_0 = arith.constant 0 : i32
    return %c0_i32, %arg0 : i32, i32
  }
  func.func @transform_1(%arg0: i32) -> (i32, i32) {
    %c0_i32 = arith.constant 0 : i32
    %c0_i32_0 = arith.constant 0 : i32
    %c0_i32_1 = arith.constant 0 : i32
    return %c0_i32, %c0_i32_0 : i32, i32
  }
  func.func @transform_2(%arg0: i32) -> (i32, i32) {
    %c0_i32 = arith.constant 0 : i32
    %c0_i32_0 = arith.constant 0 : i32
    %c0_i32_1 = arith.constant 0 : i32
    return %c0_i32, %c0_i32_0 : i32, i32
  }
  func.func @transform_3(%arg0: i32) -> (i32, i32) {
    %c0_i32 = arith.constant 0 : i32
    %c0_i32_0 = arith.constant 0 : i32
    %c0_i32_1 = arith.constant 0 : i32
    return %c0_i32, %c0_i32_0 : i32, i32
  }
  func.func @transform_4(%arg0: i32) -> (i32, i32) {
    %c0_i32 = arith.constant 0 : i32
    %c0_i32_0 = arith.constant 0 : i32
    %c0_i32_1 = arith.constant 0 : i32
    return %c0_i32, %c0_i32_0 : i32, i32
  }
  func.func @transform_5(%arg0: i32) -> (i32, i32) {
    %c0_i32 = arith.constant 0 : i32
    %c0_i32_0 = arith.constant 0 : i32
    return %c0_i32, %arg0 : i32, i32
  }
}

</mosaic_0001>

<bundles_post_ra>
// kernel: tpu_custom_call.1
= control target key start
LH: loop header
LB: loop body
LE: loop exit
PB: predicated region body
PF: predicated region fallthrough
CT: control target
= control target key end

     0   :  { %v487_v3 = vmov 0   ;;  %vm137_vm0 = vcmask 130048   ;;  %s714_s0 = inlined_call_operand.vmem [shape: f32[16,200], index: 0, kind: input, shape index: {}]   ;;  %s715_s1 = inlined_call_operand.vmem [shape: f32[128,16], index: 1, kind: input, shape index: {}]   ;;  %s716_s2 = inlined_call_operand.vmem [shape: f32[128,1], index: 2, kind: input, shape index: {}]   ;;  %s717_s3 = inlined_call_operand.vmem [shape: f32[4,128], index: 3, kind: input, shape index: {}]   ;;  %s718_s4 = inlined_call_operand.vmem [shape: f32[4,1], index: 4, kind: input, shape index: {}]   ;;  %s719_s5 = inlined_call_operand.hbm [shape: f32[4,200], index: 5, kind: output, shape index: {}]  }
   0x1   :  { %v39_v0 = vld [vmem:[%s714_s0 + $0x10] sm:$0xff]  ;;  %v40_v1 = vld [vmem:[%s714_s0 + $0x18] sm:$0xff]  ;;  %458 = vset.pattern.permute.xlu0 %v487_v3  ;;  %v37_v4 = vld [vmem:[%s714_s0] sm:$0xff]  ;;  %459 = vset.pattern.permute.xlu1 %v487_v3 }
   0x2   :  { %v56_v2 = vld [vmem:[%s716_s2 + $0x78] sm:$0xff]  ;;  %200 = vmatpush.msra.mxu0 %v39_v0  ;;  %452 = vmatpush.msra.mxu2 %v39_v0  ;;  %v38_v5 = vld [vmem:[%s714_s0 + $0x8] sm:$0xff]  ;;  %v21_v6 = vld [vmem:[%s715_s1] sm:$0xff] }
   0x3   :  { %265 = vmatpush.msra.mxu1 %v40_v1  ;;  %454 = vmatpush.msra.mxu3 %v40_v1  ;;  %v31_v7 = vld [vmem:[%s715_s1 + $0x50] sm:$0xff]  ;;  %v543_v8 = vld [vmem:[%s715_s1 + $0x48] sm:$0xff]  ;;  %v52_v10 = vld [vmem:[%s716_s2 + $0x58] sm:$0xff] }
   0x4   :  { %134 = vperm.xlu0 %458, %v56_v2   ;;  %201 = vmatpush.msra.mxu0 %v37_v4  ;;  %v54_v9 = vld [vmem:[%s716_s2 + $0x68] sm:$0xff]  ;;  %v55_v11 = vld [vmem:[%s716_s2 + $0x70] sm:$0xff] }
   0x5   :  { %453 = vmatpush.msra.mxu2 %v37_v4  ;;  %266 = vmatpush.msra.mxu1 %v38_v5 }
   0x6   :  { %455 = vmatpush.msra.mxu3 %v38_v5  ;;  %420 = vmatmul.msk.f32.vlgmr.msra.gmra.mxu0 %vm137_vm0, %v21_v6 }
   0x7   :  { %430 = vmatmul.msk.f32.vlgmr.msra.gmra.mxu2 %vm137_vm0, %v31_v7  ;;  %436 = vmatmul.msk.f32.vlgmr.msra.gmra.mxu1 %vm137_vm0, %v21_v6 }
   0x8   :  { %445 = vmatmul.msk.f32.vlgmr.msra.gmra.mxu3 %vm137_vm0, %v543_v8  ;;  %460 = vset.pattern.permute.xlu2 %v487_v3 }
   0x9   :  { %124 = vperm.xlu1 %459, %v54_v9   ;;  %114 = vperm.xlu2 %460, %v52_v10  }
   0xa   :  { %10 = vsyncpa [#allocation3], 0  ;;  %v22_v12 = vld [vmem:[%s715_s1 + $0x8] sm:$0xff]  ;;  %v32_v13 = vld [vmem:[%s715_s1 + $0x58] sm:$0xff]  ;;  %vm398_vm1 = vcmask 1043456   ;;  %vm401_vm2 = vcmask 588804  }
   0xb   :  { %v53_v14 = vld [vmem:[%s716_s2 + $0x60] sm:$0xff]  ;;  %v51_v15 = vld [vmem:[%s716_s2 + $0x50] sm:$0xff]  ;;  %v50_v16 = vld [vmem:[%s716_s2 + $0x48] sm:$0xff]  ;;  %s488_s13 = smov [#allocation2]   ;;  %s411_s16 = sshll.u32 %s719_s5, 4  ;;  %s412_s16 = int_to_ptr.hbm [resolvable:$true] %s411_s16 }
   0xc   :  { %129 = vperm.xlu0 %458, %v55_v11   ;;  %v23_v17 = vld [vmem:[%s715_s1 + $0x10] sm:$0xff]  ;;  %v33_v18 = vld [vmem:[%s715_s1 + $0x60] sm:$0xff]  ;;  %v48_v20 = vld [vmem:[%s716_s2 + $0x38] sm:$0xff]  ;;  %s409_s14 = sshll.u32 %s488_s13, 4  ;;  %s410_s14 = int_to_ptr.vmem [resolvable:$true] %s409_s14 }
   0xd   :  { %v49_v19 = vld [vmem:[%s716_s2 + $0x40] sm:$0xff]  ;;  %v47_v21 = vld [vmem:[%s716_s2 + $0x30] sm:$0xff]  ;;  %v24_v22 = vld [vmem:[%s715_s1 + $0x18] sm:$0xff] }
   0xe   :  { %421 = vmatmul.msk.f32.gmra.mxu0 %vm137_vm0, %v22_v12  ;;  %v34_v23 = vld [vmem:[%s715_s1 + $0x68] sm:$0xff]  ;;  %v45_v25 = vld [vmem:[%s716_s2 + $0x20] sm:$0xff]  ;;  %v44_v26 = vld [vmem:[%s716_s2 + $0x18] sm:$0xff] }
   0xf   :  { %431 = vmatmul.msk.f32.gmra.mxu2 %vm137_vm0, %v32_v13  ;;  %437 = vmatmul.msk.f32.gmra.mxu1 %vm137_vm0, %v22_v12  ;;  %v46_v24 = vld [vmem:[%s716_s2 + $0x28] sm:$0xff]  ;;  %v25_v27 = vld [vmem:[%s715_s1 + $0x20] sm:$0xff]  ;;  %v35_v28 = vld [vmem:[%s715_s1 + $0x70] sm:$0xff] }
  0x10   :  { %446 = vmatmul.msk.f32.gmra.mxu3 %vm137_vm0, %v31_v7  ;;  %v43_v29 = vld [vmem:[%s716_s2 + $0x10] sm:$0xff]  ;;  %v42_v30 = vld [vmem:[%s716_s2 + $0x8] sm:$0xff]  ;;  %v41_v31 = vld [vmem:[%s716_s2] sm:$0xff] }
  0x11   :  { %119 = vperm.xlu1 %459, %v53_v14   ;;  %109 = vperm.xlu2 %460, %v51_v15   ;;  %v26_v32 = vld [vmem:[%s715_s1 + $0x28] sm:$0xff]  ;;  %v36_v33 = vld [vmem:[%s715_s1 + $0x78] sm:$0xff]  ;;  %v349_v34 = vld [vmem:[%s718_s4] sm:$0xf] }
  0x12   :  { %v27_v35 = vld [vmem:[%s715_s1 + $0x30] sm:$0xff]  ;;  %v28_v36 = vld [vmem:[%s715_s1 + $0x38] sm:$0xff]  ;;  %v29_v37 = vld [vmem:[%s715_s1 + $0x40] sm:$0xff] }
  0x13   :  { %vm402_vm3 = vmor %vm401_vm2, %vm398_vm1 }
  0x14   :  { %104 = vperm.xlu0 %458, %v50_v16  }
  0x16   :  { %422 = vmatmul.msk.f32.gmra.mxu0 %vm137_vm0, %v23_v17 }
  0x17   :  { %432 = vmatmul.msk.f32.gmra.mxu2 %vm137_vm0, %v33_v18  ;;  %438 = vmatmul.msk.f32.gmra.mxu1 %vm137_vm0, %v23_v17 }
  0x18   :  { %447 = vmatmul.msk.f32.gmra.mxu3 %vm137_vm0, %v32_v13 }
  0x19   :  { %99 = vperm.xlu1 %459, %v49_v19   ;;  %94 = vperm.xlu2 %460, %v48_v20  }
  0x1c   :  { %89 = vperm.xlu0 %458, %v47_v21  }
  0x1e   :  { %423 = vmatmul.msk.f32.gmra.mxu0 %vm137_vm0, %v24_v22 }
  0x1f   :  { %433 = vmatmul.msk.f32.gmra.mxu2 %vm137_vm0, %v34_v23  ;;  %439 = vmatmul.msk.f32.gmra.mxu1 %vm137_vm0, %v24_v22 }
  0x20   :  { %448 = vmatmul.msk.f32.gmra.mxu3 %vm137_vm0, %v33_v18 }
  0x21   :  { %84 = vperm.xlu1 %459, %v46_v24   ;;  %79 = vperm.xlu2 %460, %v45_v25  }
  0x24   :  { %74 = vperm.xlu0 %458, %v44_v26  }
  0x26   :  { %424 = vmatmul.msk.f32.gmra.mxu0 %vm137_vm0, %v25_v27 }
  0x27   :  { %434 = vmatmul.msk.f32.gmra.mxu2 %vm137_vm0, %v35_v28  ;;  %440 = vmatmul.msk.f32.gmra.mxu1 %vm137_vm0, %v25_v27 }
  0x28   :  { %449 = vmatmul.msk.f32.gmra.mxu3 %vm137_vm0, %v34_v23 }
  0x29   :  { %69 = vperm.xlu1 %459, %v43_v29   ;;  %64 = vperm.xlu2 %460, %v42_v30  }
  0x2c   :  { %59 = vperm.xlu0 %458, %v41_v31  }
  0x2e   :  { %425 = vmatmul.msk.f32.gmra.mxu0 %vm137_vm0, %v26_v32 }
  0x2f   :  { %435 = vmatmul.msk.f32.gmra.mxu2 %vm137_vm0, %v36_v33  ;;  %441 = vmatmul.msk.f32.gmra.mxu1 %vm137_vm0, %v26_v32 }
  0x30   :  { %450 = vmatmul.msk.f32.gmra.mxu3 %vm137_vm0, %v35_v28 }
  0x31   :  { %352 = vperm.xlu1 %459, %v349_v34  }
  0x36   :  { %426 = vmatmul.msk.f32.gmra.mxu0 %vm137_vm0, %v27_v35 }
  0x37   :  { %442 = vmatmul.msk.f32.gmra.mxu1 %vm137_vm0, %v27_v35 }
  0x38   :  { %451 = vmatmul.msk.f32.gmra.mxu3 %vm137_vm0, %v36_v33 }
  0x3e   :  { %427 = vmatmul.msk.f32.gmra.mxu0 %vm137_vm0, %v28_v36 }
  0x3f   :  { %443 = vmatmul.msk.f32.gmra.mxu1 %vm137_vm0, %v28_v36 }
  0x46   :  { %428 = vmatmul.msk.f32.gmra.mxu0 %vm137_vm0, %v29_v37 }
  0x47   :  { %444 = vmatmul.msk.f32.gmra.mxu1 %vm137_vm0, %v29_v37 }
  0x4e   :  { %429 = vmatmul.msk.f32.gmra.mxu0 %vm137_vm0, %v543_v8 }
  0x63   :  { %v115_v60 = vpop.permute.xlu2 %114 }
  0x6b   :  { %v110_v10 = vpop.permute.xlu2 %109 }
  0x73   :  { %v95_v29 = vpop.permute.xlu2 %94 }
  0x76   :  { %v135_v53 = vpop.permute.xlu0 %134 }
  0x7b   :  { %v125_v58 = vpop.permute.xlu1 %124 }
  0x7e   :  { %v130_v62 = vpop.permute.xlu0 %129 }
  0x83   :  { %v666_v38 = vpop.f32.mrf.mxu0  ;;  %v120_v5 = vpop.permute.xlu1 %119 }
  0x84   :  { %v668_v39 = vpop.f32.mrf.mxu1 }
  0x86   :  { %v105_v11 = vpop.permute.xlu0 %104 }
  0x8a   :  { %v233_v40 = vpop.f32.mrf.mxu2 }
  0x8b   :  { %v670_v41 = vpop.f32.mrf.mxu3  ;;  %v672_v42 = vpop.f32.mrf.mxu0  ;;  %v234_v15 = vadd.f32 %v233_v40, %v110_v10 }
  0x8c   :  { %v674_v43 = vpop.f32.mrf.mxu1  ;;  %v100_v26 = vpop.permute.xlu1 %99  ;;  %v296_v37 = vadd.f32 %v670_v41, %v105_v11 }
  0x8d   :  { %v336_v25 = vmax.f32 %v234_v15, 0.0 }
  0x8e   :  { %v90_v30 = vpop.permute.xlu0 %89 }
  0x92   :  { %v236_v44 = vpop.f32.mrf.mxu2 }
  0x93   :  { %v298_v45 = vpop.f32.mrf.mxu3  ;;  %v676_v46 = vpop.f32.mrf.mxu0  ;;  %v237_v13 = vadd.f32 %v236_v44, %v115_v60 }
  0x94   :  { %v678_v47 = vpop.f32.mrf.mxu1  ;;  %v299_v33 = vadd.f32 %v298_v45, %v110_v10 }
  0x95   :  { %v338_v21 = vmax.f32 %v237_v13, 0.0 }
  0x96   :  { %v337_v44 = vmax.f32 %v299_v33, 0.0 }
  0x9a   :  { %v239_v48 = vpop.f32.mrf.mxu2 }
  0x9b   :  { %v301_v49 = vpop.f32.mrf.mxu3  ;;  %v680_v50 = vpop.f32.mrf.mxu0  ;;  %v240_v12 = vadd.f32 %v239_v48, %v120_v5 }
  0x9c   :  { %v682_v51 = vpop.f32.mrf.mxu1  ;;  %v302_v31 = vadd.f32 %v301_v49, %v115_v60  ;;  %v75_v49 = vpop.permute.xlu0 %74 }
  0x9d   :  { %v340_v16 = vmax.f32 %v240_v12, 0.0 }
  0x9e   :  { %v339_v40 = vmax.f32 %v302_v31, 0.0 }
  0xa2   :  { %v242_v52 = vpop.f32.mrf.mxu2 }
  0xa3   :  { %v304_v54 = vpop.f32.mrf.mxu3  ;;  %v684_v55 = vpop.f32.mrf.mxu0  ;;  %v243_v6 = vadd.f32 %v242_v52, %v125_v58 }
  0xa4   :  { %v686_v56 = vpop.f32.mrf.mxu1  ;;  %v305_v27 = vadd.f32 %v304_v54, %v120_v5  ;;  %v85_v52 = vpop.permute.xlu1 %84 }
  0xa5   :  { %v342_v14 = vmax.f32 %v243_v6, 0.0 }
  0xa6   :  { %v341_v34 = vmax.f32 %v305_v27, 0.0 }
  0xaa   :  { %v245_v57 = vpop.f32.mrf.mxu2 }
  0xab   :  { %v307_v59 = vpop.f32.mrf.mxu3  ;;  %v688_v61 = vpop.f32.mrf.mxu0  ;;  %v246_v0 = vadd.f32 %v245_v57, %v130_v62 }
  0xac   :  { %v690_v63 = vpop.f32.mrf.mxu1  ;;  %v308_v23 = vadd.f32 %v307_v59, %v125_v58  ;;  %v80_v57 = vpop.permute.xlu2 %79 }
  0xad   :  { %v344_v7 = vmax.f32 %v246_v0, 0.0  ;;  %v284_v0 = vadd.f32 %v690_v63, %v85_v52  ;;  %v70_v10 = vpop.permute.xlu1 %69  ;;  %v216_v15 = vadd.f32 %v684_v55, %v80_v57 }
  0xae   :  { %v343_v32 = vmax.f32 %v308_v23, 0.0  ;;  %v275_v12 = vadd.f32 %v678_v47, %v70_v10 }
  0xb0   :  { %v321_v47 = vmax.f32 %v275_v12, 0.0 }
  0xb2   :  { %v248_v1 = vpop.f32.mrf.mxu2 }
  0xb3   :  { %v249_v2 = vadd.f32 %v248_v1, %v135_v53  ;;  %v310_v3 = vpop.f32.mrf.mxu3  ;;  %v692_v4 = vpop.f32.mrf.mxu0 }
  0xb4   :  { %v286_v9 = vpop.f32.mrf.mxu1  ;;  %v311_v18 = vadd.f32 %v310_v3, %v130_v62  ;;  %v281_v3 = vadd.f32 %v686_v56, %v80_v57  ;;  %v222_v6 = vadd.f32 %v692_v4, %v90_v30  ;;  %v65_v56 = vpop.permute.xlu2 %64 }
  0xb5   :  { %v346_v8 = vmax.f32 %v249_v2, 0.0  ;;  %v287_v58 = vadd.f32 %v286_v9, %v90_v30  ;;  %v327_v9 = vmax.f32 %v284_v0, 0.0  ;;  %v207_v55 = vadd.f32 %v672_v42, %v65_v56 }
  0xb6   :  { %v345_v28 = vmax.f32 %v311_v18, 0.0  ;;  %v325_v13 = vmax.f32 %v281_v3, 0.0  ;;  %v328_v4 = vmax.f32 %v222_v6, 0.0 }
  0xb7   :  { %355 = vmatpush.msrb.mxu2 %v346_v8  ;;  %v329_v5 = vmax.f32 %v287_v58, 0.0  ;;  %v278_v8 = vadd.f32 %v682_v51, %v75_v49 }
  0xb9   :  { %356 = vmatpush.msrb.mxu2 %v344_v7  ;;  %v323_v51 = vmax.f32 %v278_v8, 0.0 }
  0xbb   :  { %v313_v17 = vpop.f32.mrf.mxu3  ;;  %357 = vmatpush.msrb.mxu2 %v342_v14  ;;  %v224_v20 = vpop.f32.mrf.mxu0 }
  0xbc   :  { %v314_v19 = vadd.f32 %v313_v17, %v135_v53  ;;  %v289_v22 = vpop.f32.mrf.mxu1  ;;  %v335_v53 = vmax.f32 %v296_v37, 0.0  ;;  %v225_v1 = vadd.f32 %v224_v20, %v95_v29  ;;  %v60_v14 = vpop.permute.xlu0 %59  ;;  %v213_v17 = vadd.f32 %v680_v50, %v75_v49  ;;  %v348_v50 = vld [vmem:[%s717_s3] sm:$0xf] }
  0xbd   :  { %358 = vmatpush.msrb.mxu2 %v340_v16  ;;  %v290_v54 = vadd.f32 %v289_v22, %v95_v29  ;;  %v272_v16 = vadd.f32 %v674_v43, %v65_v56  ;;  %v324_v20 = vmax.f32 %v216_v15, 0.0 }
  0xbe   :  { %v347_v24 = vmax.f32 %v314_v19, 0.0  ;;  %v330_v63 = vmax.f32 %v225_v1, 0.0  ;;  %v210_v19 = vadd.f32 %v676_v46, %v70_v10  ;;  %v322_v22 = vmax.f32 %v213_v17, 0.0 }
  0xbf   :  { %359 = vmatpush.msrb.mxu2 %v338_v21  ;;  %v331_v41 = vmax.f32 %v290_v54, 0.0  ;;  %v319_v21 = vmax.f32 %v272_v16, 0.0  ;;  %v318_v46 = vmax.f32 %v207_v55, 0.0 }
  0xc0   :  { %375 = vmatpush.msrb.mxu3 %v347_v24  ;;  %v320_v23 = vmax.f32 %v210_v19, 0.0 }
  0xc1   :  { %360 = vmatpush.msrb.mxu2 %v336_v25  ;;  %v353_v25 = vpop.permute.xlu1 %352 }
  0xc2   :  { %376 = vmatpush.msrb.mxu3 %v345_v28 }
  0xc3   :  { %v227_v35 = vpop.f32.mrf.mxu0 }
  0xc4   :  { %377 = vmatpush.msrb.mxu3 %v343_v32  ;;  %v292_v36 = vpop.f32.mrf.mxu1  ;;  %v228_v60 = vadd.f32 %v227_v35, %v100_v26 }
  0xc5   :  { %v293_v48 = vadd.f32 %v292_v36, %v100_v26 }
  0xc6   :  { %378 = vmatpush.msrb.mxu3 %v341_v34  ;;  %v332_v7 = vmax.f32 %v228_v60, 0.0 }
  0xc7   :  { %v333_v59 = vmax.f32 %v293_v48, 0.0 }
  0xc8   :  { %379 = vmatpush.msrb.mxu3 %v339_v40 }
  0xca   :  { %380 = vmatpush.msrb.mxu3 %v337_v44 }
  0xcb   :  { %v230_v45 = vpop.f32.mrf.mxu0 }
  0xcc   :  { %381 = vmatpush.msrb.mxu3 %v335_v53  ;;  %v231_v62 = vadd.f32 %v230_v45, %v105_v11  ;;  %v219_v11 = vadd.f32 %v688_v61, %v85_v52  ;;  %v269_v61 = vadd.f32 %v668_v39, %v60_v14  ;;  %v204_v39 = vadd.f32 %v666_v38, %v60_v14 }
  0xce   :  { %382 = vmatpush.msrb.mxu3 %v333_v59  ;;  %v334_v2 = vmax.f32 %v231_v62, 0.0  ;;  %v326_v18 = vmax.f32 %v219_v11, 0.0  ;;  %v317_v43 = vmax.f32 %v269_v61, 0.0  ;;  %v316_v24 = vmax.f32 %v204_v39, 0.0 }
  0xd0   :  { %383 = vmatpush.msrb.mxu3 %v331_v41  ;;  %361 = vmatpush.msrb.mxu2 %v334_v2 }
  0xd2   :  { %384 = vmatpush.msrb.mxu3 %v329_v5  ;;  %362 = vmatpush.msrb.mxu2 %v332_v7 }
  0xd4   :  { %385 = vmatpush.msrb.mxu3 %v327_v9  ;;  %363 = vmatpush.msrb.mxu2 %v330_v63 }
  0xd6   :  { %386 = vmatpush.msrb.mxu3 %v325_v13  ;;  %364 = vmatpush.msrb.mxu2 %v328_v4 }
  0xd8   :  { %387 = vmatpush.msrb.mxu3 %v323_v51  ;;  %365 = vmatpush.msrb.mxu2 %v326_v18 }
  0xda   :  { %388 = vmatpush.msrb.mxu3 %v321_v47  ;;  %366 = vmatpush.msrb.mxu2 %v324_v20 }
  0xdc   :  { %389 = vmatpush.msrb.mxu3 %v319_v21  ;;  %367 = vmatpush.msrb.mxu2 %v322_v22 }
  0xde   :  { %390 = vmatpush.msrb.mxu3 %v317_v43  ;;  %368 = vmatpush.msrb.mxu2 %v320_v23 }
  0xdf   :  { %391 = vmatmul.f32.vlgmr.msrb.gmra.mxu3 %v348_v50 }
  0xe0   :  { %369 = vmatpush.msrb.mxu2 %v318_v46 }
  0xe2   :  { %370 = vmatpush.msrb.mxu2 %v316_v24 }
  0xe3   :  { %371 = vmatmul.f32.vlgmr.msrb.gmra.mxu2 %v348_v50 }
 0x162   :  { %v392_v42 = vpop.f32.mrf.mxu3 }
 0x163   :  { %v393_v26 = vadd.f32 %v392_v42, %v353_v25 }
 0x165   :  { %v397_v27 = vrot.slane %v393_v26, 4 }
 0x166   :  { %v372_v38 = vpop.f32.mrf.mxu2 }
 0x167   :  { %v373_v28 = vadd.f32 %v372_v38, %v353_v25 }
 0x169   :  { %v399_v29 = vsel %vm398_vm1, %v373_v28, %v397_v27 }
 0x16a   :  { %403 = vst.msk [vmem:[#allocation2] sm:$0xff] %vm402_vm3, %v399_v29 }
 0x16b   :  { %414 = dma.vmem_to_hbm [thread:$0]  %s410_s14, 128, %s412_s16, [#allocation3]  }
 0x16c   :  { %485 = dma.done.wait [#allocation3], 128  }
 0x16d   :  { %486 = vsyncadd [#allocation3], 4294967168 }
 0x16e   :  { %419 = vsyncpa [#allocation3], 1 }

</bundles_post_ra>
